<compile_context>
chip_gen: v5e
topology: v5e:2x2
jax: 0.10.0
libtpu: 0.0.40
codegen_flags: <defaults>
</compile_context>

<pallas_src>
import functools

import jax
import jax.numpy as jnp
from jax import lax
from jax.experimental import pallas as pl
from jax.experimental.pallas import tpu as pltpu


def _sepconv_kernel(x_ref, w_ref, o_ref, slab_ref, *, KH, KW, C, Wp, L):
    """One batch image per grid step.

    x_ref:    (1, C, Hp*Wp)      flattened padded image (VMEM)
    w_ref:    (Cout, KH*KW*C)    fused depthwise*pointwise weight (VMEM)
    o_ref:    (1, Cout, L)       lane-dense flattened output (VMEM)
    slab_ref: (KH*KW*C, L)       im2col scratch slab (VMEM)
    """
    # Build the im2col slab: one contiguous lane slice per (di, dj) tap,
    # shared across all C channels (KH*KW slices total, not C*KH*KW).
    for di in range(KH):
        for dj in range(KW):
            k = di * KW + dj
            off = di * Wp + dj
            slab_ref[k * C:(k + 1) * C, :] = (
                x_ref[0, :, off:off + L].astype(jnp.float32))

    # Single MXU matmul = fused depthwise + pointwise conv.
    out = jnp.dot(w_ref[...], slab_ref[...],
                  precision=jax.lax.Precision.HIGHEST,
                  preferred_element_type=jnp.float32)      # (Cout, L)
    o_ref[0] = out.astype(o_ref.dtype)


def separable_conv2d(x, dw_weight, pw_weight):
    """x: (N, C, H, W); dw_weight: (C, KH, KW); pw_weight: (Cout, C). No bias.

    Matches PyTorch SeparableConv2d: Conv2d(C, C, (KH, KW), groups=C,
    padding='same', bias=False) followed by Conv2d(C, Cout, 1, bias=False).
    """
    N, C, H, W = x.shape
    _, KH, KW = dw_weight.shape
    Cout = pw_weight.shape[0]

    # PyTorch padding='same' with stride 1: lo = (k-1)//2, hi = (k-1)-lo per
    # spatial dim (this split matches PyTorch for both odd and even kernels).
    ph_lo = (KH - 1) // 2
    pw_lo = (KW - 1) // 2
    Hp, Wp = H + KH - 1, W + KW - 1
    # TODO(synk): at EEG-scale widths handle the halo in-kernel (masked edge
    # taps) instead of a wrapper-side jnp.pad; it is noise at these sizes.
    xp = jnp.pad(x, ((0, 0), (0, 0),
                     (ph_lo, KH - 1 - ph_lo),
                     (pw_lo, KW - 1 - pw_lo)))
    # Flatten (Hp, Wp) -> Hp*Wp so every (di, dj) tap is a contiguous slice.
    xpf = xp.reshape(N, C, Hp * Wp).astype(jnp.float32)
    # Flat output index q = h*Wp + w; the largest valid one is (H-1)*Wp + W-1,
    # so L = H*Wp - (KW-1) lanes cover all valid outputs and every slice
    # [off, off+L) stays inside the Hp*Wp flattened image.
    L = H * Wp - (KW - 1)

    # Fused effective weight: w_eff[o, (di*KW+dj)*C + c] = pw[o,c]*dw[c,di,dj]
    dw2 = dw_weight.reshape(C, KH * KW).astype(jnp.float32)       # (C, KH*KW)
    w_eff = (pw_weight.astype(jnp.float32)[:, None, :]
             * dw2.T[None, :, :]).reshape(Cout, KH * KW * C)

    kernel = functools.partial(_sepconv_kernel, KH=KH, KW=KW, C=C, Wp=Wp, L=L)
    out_flat = pl.pallas_call(
        kernel,
        out_shape=jax.ShapeDtypeStruct((N, Cout, L), x.dtype),
        grid_spec=pltpu.PrefetchScalarGridSpec(
            num_scalar_prefetch=0,
            grid=(N,),
            in_specs=[
                pl.BlockSpec((1, C, Hp * Wp), lambda n: (n, 0, 0)),
                # Fused weight resident in VMEM so it can feed the MXU; the
                # same block is reused by every grid step.
                pl.BlockSpec((Cout, KH * KW * C), lambda n: (0, 0)),
            ],
            out_specs=pl.BlockSpec((1, Cout, L), lambda n: (n, 0, 0)),
            scratch_shapes=[pltpu.VMEM((KH * KW * C, L), jnp.float32)],
        ),
        compiler_params=pltpu.CompilerParams(
            dimension_semantics=("parallel",)),
    )(xpf, w_eff)

    # Un-flatten: valid outputs live at flat index h*Wp + w with w < W.
    out_flat = jnp.pad(out_flat, ((0, 0), (0, 0), (0, H * Wp - L)))
    return out_flat.reshape(N, Cout, H, Wp)[:, :, :, :W].astype(x.dtype)


def _reference(x, dw_weight, pw_weight):
    """Pure-JAX reference (matches PyTorch Conv2d padding='same', stride 1)."""
    C = x.shape[1]
    dw = dw_weight[:, None, :, :]                 # (C, 1, KH, KW), groups=C
    out = lax.conv_general_dilated(
        x, dw, window_strides=(1, 1), padding='SAME',
        dimension_numbers=('NCHW', 'OIHW', 'NCHW'),
        feature_group_count=C, precision=lax.Precision.HIGHEST)
    pw = pw_weight[:, :, None, None]              # (Cout, C, 1, 1)
    out = lax.conv_general_dilated(
        out, pw, window_strides=(1, 1), padding='VALID',
        dimension_numbers=('NCHW', 'OIHW', 'NCHW'),
        precision=lax.Precision.HIGHEST)
    return out


if __name__ == "__main__":
    def run_case(seed, N, C, H, W, Cout, KH, KW):
        k1, k2, k3 = jax.random.split(jax.random.PRNGKey(seed), 3)
        x = jax.random.normal(k1, (N, C, H, W), jnp.float32)
        dw_weight = jax.random.normal(k2, (C, KH, KW), jnp.float32) * 0.1
        pw_weight = jax.random.normal(k3, (Cout, C), jnp.float32) * 0.1
        out = jax.block_until_ready(separable_conv2d(x, dw_weight, pw_weight))
        ref = _reference(x, dw_weight, pw_weight)
        assert out.shape == (N, Cout, H, W)
        assert jnp.allclose(out, ref, atol=1e-4, rtol=1e-4), (
            f"mismatch vs reference for case {(N, C, H, W, Cout, KH, KW)}")

    # SeparableConv2d(4 -> 8, kernel 3x3): generic 2-D case.
    run_case(0, 2, 4, 16, 16, 8, 3, 3)
    # EEGNet-style SeparableConv2d: kernel [1, 16] along the time axis.
    run_case(1, 2, 4, 1, 160, 8, 1, 16)

    print("KERNEL_OK")
</pallas_src>

<mosaic_0001>
module attributes {stable_mosaic.version = 11 : i64} {
  func.func @_sepconv_kernel(%arg0: i32, %arg1: memref<1x4x324xf32, #tpu.memory_space<vmem>>, %arg2: memref<8x36xf32, #tpu.memory_space<vmem>>, %arg3: memref<1x8x286xf32, #tpu.memory_space<vmem>>, %arg4: memref<36x286xf32, #tpu.memory_space<vmem>>) attributes {dimension_semantics = [#tpu.dimension_semantics<parallel>], iteration_bounds = array<i64: 2>, scalar_prefetch = 0 : i64, scratch_operands = 1 : i64, tpu.core_type = #tpu.core_type<tc>, window_params = [{transform_indices = @transform_0, window_bounds = array<i64: 1, 4, 324>}, {pipeline_mode = #tpu.pipeline_mode<synchronous>, transform_indices = @transform_1, window_bounds = array<i64: 8, 36>}, {transform_indices = @transform_2, window_bounds = array<i64: 1, 8, 286>}]} {
    %c0 = arith.constant 0 : index
    %c0_0 = arith.constant 0 : index
    %c0_1 = arith.constant 0 : index
    %0 = vector.load %arg1[%c0, %c0_0, %c0_1] : memref<1x4x324xf32, #tpu.memory_space<vmem>>, vector<1x4x286xf32>
    %1 = vector.shape_cast %0 : vector<1x4x286xf32> to vector<4x286xf32>
    %c0_2 = arith.constant 0 : index
    %c0_3 = arith.constant 0 : index
    %2 = vector.load %arg4[%c0_2, %c0_3] : memref<36x286xf32, #tpu.memory_space<vmem>>, vector<4x286xf32>
    tpu.vector_store %arg4[%c0_2, %c0_3], %1 {strides = array<i32>} : memref<36x286xf32, #tpu.memory_space<vmem>>, vector<4x286xf32>,
    %c0_4 = arith.constant 0 : index
    %c0_5 = arith.constant 0 : index
    %c1 = arith.constant 1 : index
    %3 = vector.load %arg1[%c0_4, %c0_5, %c1] : memref<1x4x324xf32, #tpu.memory_space<vmem>>, vector<1x4x286xf32>
    %4 = vector.shape_cast %3 : vector<1x4x286xf32> to vector<4x286xf32>
    %c4 = arith.constant 4 : index
    %c0_6 = arith.constant 0 : index
    %5 = vector.load %arg4[%c4, %c0_6] : memref<36x286xf32, #tpu.memory_space<vmem>>, vector<4x286xf32>
    tpu.vector_store %arg4[%c4, %c0_6], %4 {strides = array<i32>} : memref<36x286xf32, #tpu.memory_space<vmem>>, vector<4x286xf32>,
    %c0_7 = arith.constant 0 : index
    %c0_8 = arith.constant 0 : index
    %c2 = arith.constant 2 : index
    %6 = vector.load %arg1[%c0_7, %c0_8, %c2] : memref<1x4x324xf32, #tpu.memory_space<vmem>>, vector<1x4x286xf32>
    %7 = vector.shape_cast %6 : vector<1x4x286xf32> to vector<4x286xf32>
    %c8 = arith.constant 8 : index
    %c0_9 = arith.constant 0 : index
    %8 = vector.load %arg4[%c8, %c0_9] : memref<36x286xf32, #tpu.memory_space<vmem>>, vector<4x286xf32>
    tpu.vector_store %arg4[%c8, %c0_9], %7 {strides = array<i32>} : memref<36x286xf32, #tpu.memory_space<vmem>>, vector<4x286xf32>,
    %c0_10 = arith.constant 0 : index
    %c0_11 = arith.constant 0 : index
    %c18 = arith.constant 18 : index
    %9 = vector.load %arg1[%c0_10, %c0_11, %c18] : memref<1x4x324xf32, #tpu.memory_space<vmem>>, vector<1x4x286xf32>
    %10 = vector.shape_cast %9 : vector<1x4x286xf32> to vector<4x286xf32>
    %c12 = arith.constant 12 : index
    %c0_12 = arith.constant 0 : index
    %11 = vector.load %arg4[%c12, %c0_12] : memref<36x286xf32, #tpu.memory_space<vmem>>, vector<4x286xf32>
    tpu.vector_store %arg4[%c12, %c0_12], %10 {strides = array<i32>} : memref<36x286xf32, #tpu.memory_space<vmem>>, vector<4x286xf32>,
    %c0_13 = arith.constant 0 : index
    %c0_14 = arith.constant 0 : index
    %c19 = arith.constant 19 : index
    %12 = vector.load %arg1[%c0_13, %c0_14, %c19] : memref<1x4x324xf32, #tpu.memory_space<vmem>>, vector<1x4x286xf32>
    %13 = vector.shape_cast %12 : vector<1x4x286xf32> to vector<4x286xf32>
    %c16 = arith.constant 16 : index
    %c0_15 = arith.constant 0 : index
    %14 = vector.load %arg4[%c16, %c0_15] : memref<36x286xf32, #tpu.memory_space<vmem>>, vector<4x286xf32>
    tpu.vector_store %arg4[%c16, %c0_15], %13 {strides = array<i32>} : memref<36x286xf32, #tpu.memory_space<vmem>>, vector<4x286xf32>,
    %c0_16 = arith.constant 0 : index
    %c0_17 = arith.constant 0 : index
    %c20 = arith.constant 20 : index
    %15 = vector.load %arg1[%c0_16, %c0_17, %c20] : memref<1x4x324xf32, #tpu.memory_space<vmem>>, vector<1x4x286xf32>
    %16 = vector.shape_cast %15 : vector<1x4x286xf32> to vector<4x286xf32>
    %c20_18 = arith.constant 20 : index
    %c0_19 = arith.constant 0 : index
    %17 = vector.load %arg4[%c20_18, %c0_19] : memref<36x286xf32, #tpu.memory_space<vmem>>, vector<4x286xf32>
    tpu.vector_store %arg4[%c20_18, %c0_19], %16 {strides = array<i32>} : memref<36x286xf32, #tpu.memory_space<vmem>>, vector<4x286xf32>,
    %c0_20 = arith.constant 0 : index
    %c0_21 = arith.constant 0 : index
    %c36 = arith.constant 36 : index
    %18 = vector.load %arg1[%c0_20, %c0_21, %c36] : memref<1x4x324xf32, #tpu.memory_space<vmem>>, vector<1x4x286xf32>
    %19 = vector.shape_cast %18 : vector<1x4x286xf32> to vector<4x286xf32>
    %c24 = arith.constant 24 : index
    %c0_22 = arith.constant 0 : index
    %20 = vector.load %arg4[%c24, %c0_22] : memref<36x286xf32, #tpu.memory_space<vmem>>, vector<4x286xf32>
    tpu.vector_store %arg4[%c24, %c0_22], %19 {strides = array<i32>} : memref<36x286xf32, #tpu.memory_space<vmem>>, vector<4x286xf32>,
    %c0_23 = arith.constant 0 : index
    %c0_24 = arith.constant 0 : index
    %c37 = arith.constant 37 : index
    %21 = vector.load %arg1[%c0_23, %c0_24, %c37] : memref<1x4x324xf32, #tpu.memory_space<vmem>>, vector<1x4x286xf32>
    %22 = vector.shape_cast %21 : vector<1x4x286xf32> to vector<4x286xf32>
    %c28 = arith.constant 28 : index
    %c0_25 = arith.constant 0 : index
    %23 = vector.load %arg4[%c28, %c0_25] : memref<36x286xf32, #tpu.memory_space<vmem>>, vector<4x286xf32>
    tpu.vector_store %arg4[%c28, %c0_25], %22 {strides = array<i32>} : memref<36x286xf32, #tpu.memory_space<vmem>>, vector<4x286xf32>,
    %c0_26 = arith.constant 0 : index
    %c0_27 = arith.constant 0 : index
    %c38 = arith.constant 38 : index
    %24 = vector.load %arg1[%c0_26, %c0_27, %c38] : memref<1x4x324xf32, #tpu.memory_space<vmem>>, vector<1x4x286xf32>
    %25 = vector.shape_cast %24 : vector<1x4x286xf32> to vector<4x286xf32>
    %c32 = arith.constant 32 : index
    %c0_28 = arith.constant 0 : index
    %26 = vector.load %arg4[%c32, %c0_28] : memref<36x286xf32, #tpu.memory_space<vmem>>, vector<4x286xf32>
    tpu.vector_store %arg4[%c32, %c0_28], %25 {strides = array<i32>} : memref<36x286xf32, #tpu.memory_space<vmem>>, vector<4x286xf32>,
    %c0_29 = arith.constant 0 : index
    %c0_30 = arith.constant 0 : index
    %27 = vector.load %arg2[%c0_29, %c0_30] : memref<8x36xf32, #tpu.memory_space<vmem>>, vector<8x36xf32>
    %c0_31 = arith.constant 0 : index
    %c0_32 = arith.constant 0 : index
    %28 = vector.load %arg4[%c0_31, %c0_32] : memref<36x286xf32, #tpu.memory_space<vmem>>, vector<36x286xf32>
    %cst = arith.constant dense<0.000000e+00> : vector<8x286xf32>
    %29 = tpu.matmul %27, %28, %cst {dimension_numbers = #tpu.dot_dimension_numbers<[1], [0], [0], [1], [0, 0, 1, 1], [], []>, precision = #tpu.contract_precision<fp32>} : vector<8x36xf32>, vector<36x286xf32>, vector<8x286xf32> -> vector<8x286xf32>
    %c0_33 = arith.constant 0 : index
    %c0_34 = arith.constant 0 : index
    %c0_35 = arith.constant 0 : index
    %30 = vector.load %arg3[%c0_33, %c0_34, %c0_35] : memref<1x8x286xf32, #tpu.memory_space<vmem>>, vector<1x8x286xf32>
    %31 = vector.shape_cast %30 : vector<1x8x286xf32> to vector<8x286xf32>
    %32 = vector.shape_cast %29 : vector<8x286xf32> to vector<1x8x286xf32>
    tpu.vector_store %arg3[%c0_33, %c0_34, %c0_35], %32 {strides = array<i32>} : memref<1x8x286xf32, #tpu.memory_space<vmem>>, vector<1x8x286xf32>,
    return
  }
  func.func @transform_0(%arg0: i32) -> (i32, i32, i32) {
    %c0_i32 = arith.constant 0 : i32
    %c0_i32_0 = arith.constant 0 : i32
    %c0_i32_1 = arith.constant 0 : i32
    return %arg0, %c0_i32, %c0_i32_0 : i32, i32, i32
  }
  func.func @transform_1(%arg0: i32) -> (i32, i32) {
    %c0_i32 = arith.constant 0 : i32
    %c0_i32_0 = arith.constant 0 : i32
    %c0_i32_1 = arith.constant 0 : i32
    return %c0_i32, %c0_i32_0 : i32, i32
  }
  func.func @transform_2(%arg0: i32) -> (i32, i32, i32) {
    %c0_i32 = arith.constant 0 : i32
    %c0_i32_0 = arith.constant 0 : i32
    %c0_i32_1 = arith.constant 0 : i32
    return %arg0, %c0_i32, %c0_i32_0 : i32, i32, i32
  }
}

</mosaic_0001>

<bundles_post_ra>
// kernel: tpu_custom_call.1
= control target key start
LH: loop header
LB: loop body
LE: loop exit
PB: predicated region body
PF: predicated region fallthrough
CT: control target
= control target key end

     0   :  { %7 = vsyncpa [#allocation4], 0  ;;  %s1727_s0 = inlined_call_operand.hbm [shape: f32[2,4,324], index: 0, kind: input, shape index: {}]   ;;  %s1728_s1 = inlined_call_operand.hbm [shape: f32[8,36], index: 1, kind: input, shape index: {}]   ;;  %s1729_s2 = inlined_call_operand.hbm [shape: f32[2,8,286], index: 2, kind: output, shape index: {}]  }
   0x1   :  { %9 = vsyncpa [#allocation4 + $0x1], 0 }
   0x2   :  { %10 = vsyncpa [#allocation7], 0 }
   0x3   :  { %11 = vsyncpa [#allocation5], 0 }
   0x4   :  { %13 = vsyncpa [#allocation5 + $0x1], 0  ;;  %s1360_s9 = smov 0   ;;  %s1362_s10 = smov 0  }
   0x5   :  { %s1364_s11 = smov 0   ;;  %s1366_s12 = smov 0  }
   0x6 LB: > { %s1381_s13 = sadd.s32 4294967295, %s1334_s12   ;;  %s1124_s14 = sadd.s32 4294967294, %s1334_s12   ;;  %s1334_s12 = sphi %s1366_s12, %s1739_s12   ;;  %s1330_s11 = sphi %s1364_s11, %s1738_s11   ;;  %s1326_s10 = sphi %s1362_s10, %s1737_s10   ;;  %s1322_s9 = sphi %s1360_s9, %s1736_s9  }
   0x7   : > { %p39_p0 = scmp.ne.s32.totalorder %s1326_s10, %s1322_s9  ;;  %p40_p1 = scmp.eq.s32.totalorder %s1381_s13, 0 }
   0x8   : > { %p84_p2 = scmp.eq.s32.totalorder %s1381_s13, 1  ;;  %p90_p3 = scmp.eq.s32.totalorder %s1124_s14, 1 }
   0x9   : > { %p1390_p4 = por %p40_p1, %p39_p0  ;;  %p1125_p5 = scmp.ge.s32.totalorder %s1334_s12, 1 }
   0xa   : > { %p1395_p6 = por %p90_p3, %p39_p0  ;;  %p97_p7 = scmp.lt.s32.totalorder %s1334_s12, 3 }
   0xb   : > { %s109_s19 = sshll.u32 %s1728_s1, 4  ;;  %s1336_s21 = smov [#allocation6]   ;;  %s110_s19 = int_to_ptr.hbm [resolvable:$true] %s109_s19 }
   0xc   : > { %p1403_p8 = pnand %p1125_p5, %p97_p7  ;;  %s111_s22 = sshll.u32 %s1336_s21, 4  ;;  %s112_s22 = int_to_ptr.vmem [resolvable:$true] %s111_s22 }
   0xd   : > { %s1413_s23 = sadd.s32 1, %s1334_s12   ;;  %s26_s24 = sadd.s32 1, %s1330_s11 }
   0xe   : > { %p1147_p10 = pneg %p1403_p8  ;;  %s23_s25 = ssub.s32 %s1334_s12, %s1413_s23 }
   0xf   : > { %p24_p12 = scmp.eq.s32.totalorder %s23_s25, 0  ;;  %p33_p13 = scmp.ne.s32.totalorder %s1330_s11, %s1326_s10 }
  0x10   : > { %p1148_p11 = pnand %p1147_p10, %p40_p1  ;;  %p34_p0 = scmp.eq.s32.totalorder %s1334_s12, 0 }
  0x11   : > { %p1160_p3 = scmp.lt.s32.totalorder %s1334_s12, 2  ;;  %p1427_p7 = por %p84_p2, %p33_p13 }
  0x12   : > { %1150 = dma.hbm_to_vmem [thread:$0]  (!%p1148_p11), %s110_s19, 128, %s112_s22, [#allocation7]  }
  0x13   : > { %s1423_s26 = scalar_select %p24_p12, %s1330_s11, %s26_s24  }
  0x14   : > { %p35_p5 = por %p34_p0, %p33_p13  ;;  %s122_s28 = sand.u32 1, %s1330_s11  }
  0x15   : > { %s1135_s29 = smul.u32 12, %s1334_s12  ;;  %s123_s17 = scalar_lea.sflag [#allocation4], %s122_s28 }
  0x16   : > { %s1134_s30 = smul.u32 12, %s122_s28  ;;  %p1436_p10 = pnand %p1160_p3, %p35_p5 }
  0x17   : > { %s131_s5 = scalar_lea.hbm %s1727_s0, %s1135_s29  ;;  %s1241_s24 = scalar_lea.hbm %s1727_s0, 24 }
  0x18   : > { %s133_s7 = sshll.u32 %s131_s5, 4  ;;  %s126_s8 = scalar_lea.vmem [#allocation3], %s1134_s30  ;;  %s134_s7 = int_to_ptr.hbm [resolvable:$true] %s133_s7 }
  0x19   : > { %s135_s14 = sshll.u32 %s126_s8, 4  ;;  %s1234_s18 = sshra.s32 %s134_s7, 4  ;;  %s136_s14 = int_to_ptr.vmem [resolvable:$true] %s135_s14  ;;  %s1235_s18 = int_to_ptr.hbm [resolvable:$true] %s1234_s18 }
  0x1a   : > { %s1236_s19 = scalar_lea.hbm %s1235_s18, 12  ;;  %p1238_p11 = pneg %p1436_p10 }
  0x1b   : > { %p1237_p2 = scmp.ne.s32.totalorder %s1235_s18, %s1236_s19  ;;  %p1242_p0 = scmp.lt.s32.totalorder %s1235_s18, %s1727_s0 }
  0x1c   : > { %p1243_p3 = scmp.lt.s32.totalorder %s1241_s24, %s1236_s19 }
  0x1d   : > { %p1239_p12 = pnand %p1238_p11, %p1237_p2 }
  0x1e   : > { %p1244_p5 = por %p1243_p3, %p1242_p0 }
  0x1f   : > { %p1240_p13 = pneg %p1239_p12 }
  0x21   : > { %p1245_p9 = pnand %p1244_p5, %p1240_p13 }
  0x23   : > { %1248 = shalt.err (!%p1245_p9)
}
  0x24   : > { %1154 = dma.hbm_to_vmem [thread:$0]  (!%p1436_p10), %s134_s7, 192, %s136_s14, %s123_s17  }
  0x25   : > { %144 = sbr.rel (%p1403_p8) target bundleno = 446 (0x1be), region = 28  ;;  %s1453_s28 = sand.u32 (!%p1403_p8), 1, %s1326_s10  }
  0x26   : > { %s1136_s30 = smul.u32 (!%p1403_p8), 12, %s1453_s28  ;;  %s147_s3 = scalar_lea.sflag (!%p1403_p8), [#allocation4], %s1453_s28 }
  0x28   : > { %s1457_s4 = scalar_lea.vmem (!%p1403_p8), [#allocation3], %s1136_s30 }
  0x2a   : > { %1309 = dma.done.wait (%p1390_p4), %s147_s3, 192  }
  0x2b   : > { %1311 = vsyncadd (%p1390_p4), %s147_s3, 4294967104 }
  0x2c   : > { %1313 = dma.done.wait (%p40_p1), [#allocation7], 128  }
  0x2d   : > { %1315 = vsyncadd (%p40_p1), [#allocation7], 4294967168  ;;  %v1468_v0 = vld [vmem:[%s1457_s4] sm:$0xff]  ;;  %v178_v1 = vld [vmem:[%s1457_s4 + $0x8] sm:$0xf]  ;;  %s1337_s15 = smov 127  }
  0x2e   : > { %181 = vst [vmem:[#allocation1] ss:$2 sm:$0xff] %v1468_v0  ;;  %v195_v2 = vld [vmem:[%s1457_s4 + $0x8] sm:$0xf]  ;;  %s1338_s20 = smov 126   ;;  %s1339_s5 = smov 110  }
  0x2f   : > { %183 = vst [vmem:[#allocation1 + $0x10] ss:$2 sm:$0xff] %v178_v1  ;;  %v222_v8 = vld [vmem:[%s1457_s4 + $0x8] sm:$0xf]  ;;  %s1340_s6 = smov 109   ;;  %s1341_s7 = smov 108  }
  0x30   : > { %v247_v12 = vld [vmem:[%s1457_s4 + $0x8] sm:$0xf]  ;;  %s1342_s8 = smov 92   ;;  %s1343_s14 = smov 91   ;;  %vm192_vm0 = vcmask 240640   ;;  %vm211_vm1 = vcmask 1039360  }
  0x31   : > { %v273_v16 = vld [vmem:[%s1457_s4 + $0x8] sm:$0xf]  ;;  %s1344_s17 = smov 90   ;;  %vm237_vm2 = vcmask 1031168   ;;  %vm263_vm3 = vcmask 900096   ;;  %vm288_vm4 = vcmask 891904  }
  0x32   : > { %v298_v20 = vld [vmem:[%s1457_s4 + $0x8] sm:$0xf]  ;;  %vm314_vm5 = vcmask 883712   ;;  %vm365_vm6 = vcmask 744448   ;;  %vm219_vm7 = vcmask 244740   ;;  %vm339_vm8 = vcmask 752640  }
  0x33   : > { %v324_v24 = vld [vmem:[%s1457_s4 + $0x8] sm:$0xf]  ;;  %vm390_vm9 = vcmask 736256   ;;  %vm415_vm10 = vcmask 293888   ;;  %vm419_vm11 = vcmask 1043456   ;;  %s1137_s18 = smul.u32 24, %s1453_s28 }
  0x34   : > { %v349_v28 = vld [vmem:[%s1457_s4 + $0x8] sm:$0xf]  ;;  %s1138_s21 = smul.u32 24, %s1381_s13  ;;  %vm1025_vm12 = vcmask 244736   ;;  %s1028_s13 = scalar_lea.sflag [#allocation5], %s1453_s28 }
  0x35   : > { %v184_v3 = vld.sshfl [vmem:[#allocation1] sm:$0xff pattern:$0x75316420]  ;;  %v185_v4 = vld.sshfl [vmem:[#allocation1 + $0x8] sm:$0xff pattern:$0x75316420] }
  0x36   : > { %199 = vst [vmem:[#allocation1 + $0x1] ss:$2 sm:$0xff] %v1468_v0  ;;  %v1474_v5 = vld.sshfl [vmem:[#allocation1 + $0x10] sm:$0xff pattern:$0x75316420]  ;;  %s1688_s19 = scalar_lea.vmem [#allocation8], %s1137_s18  ;;  %s1039_s25 = scalar_lea.hbm %s1729_s2, %s1138_s21 }
  0x37   : > { %190 = vst [vmem:[#allocation2] sm:$0xf] %v184_v3  ;;  %v375_v32 = vld [vmem:[%s1457_s4 + $0x8] sm:$0xf]  ;;  %s1041_s29 = sshll.u32 %s1688_s19, 4  ;;  %s1043_s30 = sshll.u32 %s1039_s25, 4  ;;  %s1042_s29 = int_to_ptr.vmem [resolvable:$true] %s1041_s29  ;;  %s1044_s30 = int_to_ptr.hbm [resolvable:$true] %s1043_s30 }
  0x38   : > { %191 = vst [vmem:[#allocation2 + $0x8] sm:$0xf] %v185_v4  ;;  %s1278_s3 = sshra.s32 %s1044_s30, 4  ;;  %s1279_s3 = int_to_ptr.hbm [resolvable:$true] %s1278_s3 }
  0x39   : > { %201 = vst [vmem:[#allocation1 + $0x11] ss:$2 sm:$0xff] %v195_v2  ;;  %s1280_s4 = scalar_lea.hbm %s1279_s3, 24  ;;  %p1285_p9 = scmp.lt.s32.totalorder %s1279_s3, %s1729_s2 }
  0x3a   : > { %193 = vst.msk [vmem:[#allocation2 + $0x10] sm:$0xf] %vm192_vm0, %v1474_v5  ;;  %p1281_p1 = scmp.ne.s32.totalorder %s1279_s3, %s1280_s4 }
  0x3c   : > { %p1282_p4 = pnand %p1281_p1, %p1427_p7 }
  0x3d   : > { %v202_v6 = vld.sshfl [vmem:[#allocation1] sm:$0xff pattern:$0x75316420]  ;;  %v203_v7 = vld.sshfl [vmem:[#allocation1 + $0x8] sm:$0xff pattern:$0x75316420] }
  0x3e   : > { %205 = vrot.lane.b32.xlu0 %v202_v6, %s1337_s15  ;;  %207 = vrot.lane.b32.xlu1 %v203_v7, %s1337_s15  ;;  %225 = vst [vmem:[#allocation1] ss:$2 sm:$0xff] %v1468_v0  ;;  %v399_v7 = vld [vmem:[#allocation6] sm:$0xff]  ;;  %p1283_p8 = pneg %p1282_p4 }
  0x40   : > { %v1480_v9 = vld.sshfl [vmem:[#allocation1 + $0x10] sm:$0xff pattern:$0x75316420] }
  0x41   : > { %227 = vst [vmem:[#allocation1 + $0x10] ss:$2 sm:$0xff] %v222_v8 }
  0x45   : > { %v228_v10 = vld.sshfl [vmem:[#allocation1] sm:$0xff pattern:$0x75316420]  ;;  %v229_v11 = vld.sshfl [vmem:[#allocation1 + $0x8] sm:$0xff pattern:$0x75316420] }
  0x46   : > { %231 = vrot.lane.b32.xlu2 %v228_v10, %s1338_s20  ;;  %233 = vrot.lane.b32.xlu0 %v229_v11, %s1338_s20  ;;  %251 = vst [vmem:[#allocation1 + $0x1] ss:$2 sm:$0xff] %v1468_v0  ;;  %v417_v10 = vsel %vm415_vm10, %v399_v7, 0 }
  0x48   : > { %v230_v13 = vld.sshfl [vmem:[#allocation1 + $0x10] sm:$0xff pattern:$0x75316420] }
  0x49   : > { %253 = vst [vmem:[#allocation1 + $0x11] ss:$2 sm:$0xff] %v247_v12 }
  0x4d   : > { %v254_v14 = vld.sshfl [vmem:[#allocation1] sm:$0xff pattern:$0x75316420]  ;;  %v255_v15 = vld.sshfl [vmem:[#allocation1 + $0x8] sm:$0xff pattern:$0x75316420] }
  0x4e   : > { %257 = vrot.lane.b32.xlu1 %v254_v14, %s1339_s5  ;;  %259 = vrot.lane.b32.xlu2 %v255_v15, %s1339_s5  ;;  %276 = vst [vmem:[#allocation1] ss:$2 sm:$0xff] %v1468_v0 }
  0x50   : > { %v256_v17 = vld.sshfl [vmem:[#allocation1 + $0x10] sm:$0xff pattern:$0x75316420] }
  0x51   : > { %278 = vst [vmem:[#allocation1 + $0x10] ss:$2 sm:$0xff] %v273_v16  ;;  %v1532_v16 = vand.u32 4294901760, %v417_v10 }
  0x55   : > { %v279_v18 = vld.sshfl [vmem:[#allocation1] sm:$0xff pattern:$0x75316420]  ;;  %v280_v19 = vld.sshfl [vmem:[#allocation1 + $0x8] sm:$0xff pattern:$0x75316420] }
  0x56   : > { %282 = vrot.lane.b32.xlu0 %v279_v18, %s1340_s6  ;;  %284 = vrot.lane.b32.xlu1 %v280_v19, %s1340_s6  ;;  %302 = vst [vmem:[#allocation1 + $0x1] ss:$2 sm:$0xff] %v1468_v0 }
  0x58   : > { %v281_v21 = vld.sshfl [vmem:[#allocation1 + $0x10] sm:$0xff pattern:$0x75316420] }
  0x59   : > { %304 = vst [vmem:[#allocation1 + $0x11] ss:$2 sm:$0xff] %v298_v20 }
  0x5d   : > { %v305_v22 = vld.sshfl [vmem:[#allocation1] sm:$0xff pattern:$0x75316420]  ;;  %v306_v23 = vld.sshfl [vmem:[#allocation1 + $0x8] sm:$0xff pattern:$0x75316420] }
  0x5e   : > { %308 = vrot.lane.b32.xlu2 %v305_v22, %s1341_s7  ;;  %310 = vrot.lane.b32.xlu0 %v306_v23, %s1341_s7  ;;  %327 = vst [vmem:[#allocation1] ss:$2 sm:$0xff] %v1468_v0 }
  0x60   : > { %v307_v25 = vld.sshfl [vmem:[#allocation1 + $0x10] sm:$0xff pattern:$0x75316420] }
  0x61   : > { %329 = vst [vmem:[#allocation1 + $0x10] ss:$2 sm:$0xff] %v324_v24 }
  0x65   : > { %v330_v26 = vld.sshfl [vmem:[#allocation1] sm:$0xff pattern:$0x75316420]  ;;  %v331_v27 = vld.sshfl [vmem:[#allocation1 + $0x8] sm:$0xff pattern:$0x75316420] }
  0x66   : > { %333 = vrot.lane.b32.xlu1 %v330_v26, %s1342_s8  ;;  %353 = vst [vmem:[#allocation1 + $0x1] ss:$2 sm:$0xff] %v1468_v0 }
  0x68   : > { %v332_v29 = vld.sshfl [vmem:[#allocation1 + $0x10] sm:$0xff pattern:$0x75316420] }
  0x69   : > { %355 = vst [vmem:[#allocation1 + $0x11] ss:$2 sm:$0xff] %v349_v28  ;;  %337 = vrot.lane.b32.xlu2 %v332_v29, %s1342_s8 }
  0x6d   : > { %v356_v30 = vld.sshfl [vmem:[#allocation1] sm:$0xff pattern:$0x75316420]  ;;  %v357_v31 = vld.sshfl [vmem:[#allocation1 + $0x8] sm:$0xff pattern:$0x75316420] }
  0x6e   : > { %335 = vrot.lane.b32.xlu1 %v331_v27, %s1342_s8  ;;  %378 = vst [vmem:[#allocation1] ss:$2 sm:$0xff] %v1468_v0 }
  0x70   : > { %v358_v33 = vld.sshfl [vmem:[#allocation1 + $0x10] sm:$0xff pattern:$0x75316420] }
  0x71   : > { %380 = vst [vmem:[#allocation1 + $0x10] ss:$2 sm:$0xff] %v375_v32  ;;  %359 = vrot.lane.b32.xlu2 %v356_v30, %s1343_s14 }
  0x75   : > { %v381_v34 = vld.sshfl [vmem:[#allocation1] sm:$0xff pattern:$0x75316420]  ;;  %v382_v36 = vld.sshfl [vmem:[#allocation1 + $0x8] sm:$0xff pattern:$0x75316420] }
  0x76   : > { %286 = vrot.lane.b32.xlu1 %v281_v21, %s1340_s6  ;;  %384 = vrot.lane.b32.xlu0 %v381_v34, %s1344_s17 }
  0x78   : > { %v383_v35 = vld.sshfl [vmem:[#allocation1 + $0x10] sm:$0xff pattern:$0x75316420] }
  0x79   : > { %361 = vrot.lane.b32.xlu2 %v357_v31, %s1343_s14  ;;  %v1556_v31 = vsub.f32 %v417_v10, %v1532_v16 }
  0x7e   : > { %388 = vrot.lane.b32.xlu1 %v383_v35, %s1344_s17  ;;  %386 = vrot.lane.b32.xlu0 %v382_v36, %s1344_s17 }
  0x81   : > { %312 = vrot.lane.b32.xlu2 %v307_v25, %s1341_s7 }
  0x86   : > { %261 = vrot.lane.b32.xlu1 %v256_v17, %s1339_s5  ;;  %363 = vrot.lane.b32.xlu0 %v358_v33, %s1343_s14  ;;  %s1284_s5 = scalar_lea.hbm %s1729_s2, 48 }
  0x87   : > { %p1286_p10 = scmp.lt.s32.totalorder %s1284_s5, %s1280_s4 }
  0x89   : > { %209 = vrot.lane.b32.xlu2 %v1480_v9, %s1337_s15  ;;  %p1287_p2 = por %p1286_p10, %p1285_p9 }
  0x8b   : > { %p1288_p11 = pnand %p1287_p2, %p1283_p8 }
  0x8e   : > { %235 = vrot.lane.b32.xlu0 %v230_v13, %s1338_s20 }
  0xa0   : > { %v232_v37 = vpop.permute.xlu2 %231 }
  0xa8   : > { %v1510_v38 = vpop.permute.xlu2 %259 }
  0xb0   : > { %v206_v39 = vpop.permute.xlu0 %205  ;;  %v208_v40 = vpop.permute.xlu1 %207 }
  0xb1   : > { %v212_v41 = vsel %vm211_vm1, %v206_v39, %v208_v40 }
  0xb2   : > { %217 = vst [vmem:[#allocation2] sm:$0xf0] %v212_v41 }
  0xb8   : > { %v1513_v42 = vpop.permute.xlu0 %233  ;;  %v309_v43 = vpop.permute.xlu2 %308 }
  0xb9   : > { %v238_v44 = vsel %vm237_vm2, %v232_v37, %v1513_v42  ;;  %v400_v20 = vld [vmem:[#allocation2] sm:$0xff] }
  0xba   : > { %243 = vst [vmem:[#allocation2 + $0x18] sm:$0xf] %v238_v44  ;;  %v1551_v29 = vand.u32 4294901760, %v400_v20 }
  0xc0   : > { %v258_v45 = vpop.permute.xlu1 %257 }
  0xc1   : > { %v264_v46 = vsel %vm263_vm3, %v258_v45, %v1510_v38 }
  0xc2   : > { %269 = vst [vmem:[#allocation2 + $0x18] sm:$0xf0] %v264_v46 }
  0xc3   : > { %v338_v47 = vpop.permute.xlu2 %337 }
  0xc4   : > { %347 = vst.msk [vmem:[#allocation2 + $0x58] sm:$0xf] %vm192_vm0, %v338_v47 }
  0xc8   : > { %v283_v48 = vpop.permute.xlu0 %282  ;;  %v285_v49 = vpop.permute.xlu1 %284 }
  0xc9   : > { %v289_v50 = vsel %vm288_vm4, %v283_v48, %v285_v49  ;;  %v403_v12 = vld [vmem:[#allocation2 + $0x18] sm:$0xff] }
  0xca   : > { %294 = vst [vmem:[#allocation2 + $0x30] sm:$0xf] %v289_v50  ;;  %v1542_v23 = vand.u32 4294901760, %v403_v12 }
  0xcb   : > { %v360_v51 = vpop.permute.xlu2 %359 }
  0xcc   : > { %v1562_v33 = vsub.f32 %v403_v12, %v1542_v23 }
  0xd0   : > { %v311_v52 = vpop.permute.xlu0 %310 }
  0xd1   : > { %v315_v53 = vsel %vm314_vm5, %v309_v43, %v311_v52  ;;  %v1578_v43 = vand.u32 4294901760, %v1556_v31 }
  0xd2   : > { %320 = vst [vmem:[#allocation2 + $0x30] sm:$0xf0] %v315_v53 }
  0xd3   : > { %v362_v54 = vpop.permute.xlu2 %361 }
  0xd4   : > { %v366_v55 = vsel %vm365_vm6, %v360_v51, %v362_v54 }
  0xd5   : > { %371 = vst [vmem:[#allocation2 + $0x48] sm:$0xf0] %v366_v55  ;;  %v453_v55 = vsub.f32 %v1556_v31, %v1578_v43 }
  0xd8   : > { %v334_v56 = vpop.permute.xlu1 %333 }
  0xd9   : > { %v406_v9 = vld [vmem:[#allocation2 + $0x30] sm:$0xff] }
  0xda   : > { %v1530_v15 = vand.u32 4294901760, %v406_v9 }
  0xdb   : > { %v313_v57 = vpop.permute.xlu2 %312 }
  0xdc   : > { %v316_v58 = vsel %vm314_vm5, %v311_v52, %v313_v57  ;;  %322 = vst.msk [vmem:[#allocation2 + $0x40] sm:$0xf0] %vm219_vm7, %v313_v57  ;;  %v1549_v28 = vsub.f32 %v406_v9, %v1530_v15 }
  0xdd   : > { %321 = vst [vmem:[#allocation2 + $0x38] sm:$0xf0] %v316_v58 }
  0xde   : > { %v484_v41 = vand.u32 4294901760, %v1549_v28 }
  0xe0   : > { %v336_v59 = vpop.permute.xlu1 %335  ;;  %v485_v53 = vsub.f32 %v1549_v28, %v484_v41 }
  0xe1   : > { %v340_v60 = vsel %vm339_vm8, %v334_v56, %v336_v59  ;;  %v341_v61 = vsel %vm339_vm8, %v336_v59, %v338_v47 }
  0xe2   : > { %345 = vst [vmem:[#allocation2 + $0x48] sm:$0xf] %v340_v60 }
  0xe3   : > { %346 = vst [vmem:[#allocation2 + $0x50] sm:$0xf] %v341_v61  ;;  %v210_v62 = vpop.permute.xlu2 %209 }
  0xe4   : > { %v213_v63 = vsel %vm211_vm1, %v208_v40, %v210_v62  ;;  %220 = vst.msk [vmem:[#allocation2 + $0x10] sm:$0xf0] %vm219_vm7, %v210_v62  ;;  %v1574_v40 = vsub.f32 %v400_v20, %v1551_v29 }
  0xe5   : > { %218 = vst [vmem:[#allocation2 + $0x8] sm:$0xf0] %v213_v63  ;;  %v486_v63 = vand.u32 4294901760, %v485_v53 }
  0xe8   : > { %v287_v0 = vpop.permute.xlu1 %286  ;;  %v385_v1 = vpop.permute.xlu0 %384 }
  0xe9   : > { %v290_v2 = vsel %vm288_vm4, %v285_v49, %v287_v0  ;;  %296 = vst.msk [vmem:[#allocation2 + $0x40] sm:$0xf] %vm192_vm0, %v287_v0  ;;  %v409_v8 = vld [vmem:[#allocation2 + $0x48] sm:$0xff]  ;;  %v490_v49 = vand.u32 4294901760, %v1562_v33 }
  0xea   : > { %295 = vst [vmem:[#allocation2 + $0x38] sm:$0xf] %v290_v2  ;;  %v1528_v11 = vand.u32 4294901760, %v409_v8 }
  0xeb   : > { %v491_v59 = vsub.f32 %v1562_v33, %v490_v49 }
  0xec   : > { %v1540_v22 = vsub.f32 %v409_v8, %v1528_v11  ;;  %v401_v56 = vld [vmem:[#allocation2 + $0x8] sm:$0xff] }
  0xed   : > { %v1609_v62 = vand.u32 4294901760, %v401_v56 }
  0xee   : > { %v478_v35 = vand.u32 4294901760, %v1540_v22 }
  0xef   : > { %v693_v8 = vsub.f32 %v401_v56, %v1609_v62 }
  0xf0   : > { %v389_v3 = vpop.permute.xlu1 %388  ;;  %v387_v4 = vpop.permute.xlu0 %386  ;;  %v479_v47 = vsub.f32 %v1540_v22, %v478_v35 }
  0xf1   : > { %398 = vst.msk [vmem:[#allocation2 + $0x70] sm:$0xf] %vm192_vm0, %v389_v3  ;;  %v391_v5 = vsel %vm390_vm9, %v385_v1, %v387_v4  ;;  %v392_v6 = vsel %vm390_vm9, %v387_v4, %v389_v3  ;;  %v407_v27 = vld [vmem:[#allocation2 + $0x38] sm:$0xff]  ;;  %v1613_v1 = vand.u32 4294901760, %v453_v55  ;;  %v492_v4 = vand.u32 4294901760, %v491_v59 }
  0xf2   : > { %396 = vst [vmem:[#allocation2 + $0x60] sm:$0xf] %v391_v5  ;;  %v1568_v36 = vand.u32 4294901760, %v407_v27  ;;  %v480_v58 = vand.u32 4294901760, %v479_v47 }
  0xf3   : > { %397 = vst [vmem:[#allocation2 + $0x68] sm:$0xf] %v392_v6 }
  0xf8   : > { %v262_v13 = vpop.permute.xlu1 %261  ;;  %v364_v14 = vpop.permute.xlu0 %363 }
  0xf9   : > { %v265_v17 = vsel %vm263_vm3, %v1510_v38, %v262_v13  ;;  %271 = vst.msk [vmem:[#allocation2 + $0x28] sm:$0xf0] %vm219_vm7, %v262_v13  ;;  %v367_v18 = vsel %vm365_vm6, %v362_v54, %v364_v14  ;;  %v412_v19 = vld [vmem:[#allocation2 + $0x60] sm:$0xf]  ;;  %v496_v54 = vand.u32 4294901760, %v1574_v40 }
  0xfa   : > { %270 = vst [vmem:[#allocation2 + $0x20] sm:$0xf0] %v265_v17  ;;  %v421_v21 = vsel %vm419_vm11, %v412_v19, 0  ;;  %v413_v24 = vld [vmem:[#allocation2 + $0x68] sm:$0xf] }
  0xfb   : > { %372 = vst [vmem:[#allocation2 + $0x50] sm:$0xf0] %v367_v18  ;;  %v1544_v25 = vand.u32 4294901760, %v421_v21  ;;  %v424_v26 = vsel %vm419_vm11, %v413_v24, 0  ;;  %v497_v0 = vsub.f32 %v1574_v40, %v496_v54  ;;  %v414_v17 = vld [vmem:[#allocation2 + $0x70] sm:$0xf] }
  0xfc   : > { %373 = vst.msk [vmem:[#allocation2 + $0x58] sm:$0xf0] %vm219_vm7, %v364_v14  ;;  %v1553_v30 = vand.u32 4294901760, %v424_v26  ;;  %v694_v14 = vand.u32 4294901760, %v693_v8  ;;  %v427_v20 = vsel %vm419_vm11, %v414_v17, 0 }
  0xfd   : > { %441 = vmatpush.msra.mxu0 %v1544_v25  ;;  %549 = vmatpush.msra.mxu3 %v1544_v25  ;;  %v471_v32 = vsub.f32 %v421_v21, %v1544_v25  ;;  %v498_v9 = vand.u32 4294901760, %v497_v0  ;;  %v1637_v24 = vand.u32 4294901760, %v427_v20 }
  0xfe   : > { %v1565_v34 = vsub.f32 %v424_v26, %v1553_v30  ;;  %v695_v21 = vsub.f32 %v693_v8, %v694_v14 }
  0xff   : > { %443 = vmatpush.msra.mxu0 %v1528_v11  ;;  %518 = vmatpush.msra.mxu2 %v471_v32  ;;  %v472_v37 = vand.u32 4294901760, %v471_v32 }
 0x100   : > { %551 = vmatpush.msra.mxu3 %v1528_v11  ;;  %v236_v38 = vpop.permute.xlu0 %235  ;;  %v670_v39 = vand.u32 4294901760, %v1565_v34 }
 0x101   : > { %v239_v44 = vsel %vm237_vm2, %v1513_v42, %v236_v38  ;;  %245 = vst.msk [vmem:[#allocation2 + $0x28] sm:$0xf] %vm192_vm0, %v236_v38  ;;  %445 = vmatpush.msra.mxu0 %v1530_v15  ;;  %521 = vmatpush.msra.mxu2 %v1540_v22  ;;  %v473_v45 = vsub.f32 %v471_v32, %v472_v37 }
 0x102   : > { %244 = vst [vmem:[#allocation2 + $0x20] sm:$0xf] %v239_v44  ;;  %553 = vmatpush.msra.mxu3 %v1530_v15  ;;  %v671_v46 = vsub.f32 %v1565_v34, %v670_v39  ;;  %v410_v48 = vld [vmem:[#allocation2 + $0x50] sm:$0xff]  ;;  %v1592_v42 = vsub.f32 %v407_v27, %v1568_v36  ;;  %v867_v27 = vsub.f32 %v427_v20, %v1637_v24 }
 0x103   : > { %447 = vmatpush.msra.mxu0 %v1542_v23  ;;  %524 = vmatpush.msra.mxu2 %v1549_v28  ;;  %v474_v50 = vand.u32 4294901760, %v473_v45  ;;  %v1596_v51 = vand.u32 4294901760, %v410_v48  ;;  %v411_v22 = vld [vmem:[#allocation2 + $0x58] sm:$0xff] }
 0x104   : > { %555 = vmatpush.msra.mxu3 %v1542_v23  ;;  %v672_v52 = vand.u32 4294901760, %v671_v46  ;;  %v682_v60 = vand.u32 4294901760, %v1592_v42  ;;  %v1641_v26 = vand.u32 4294901760, %v411_v22 }
 0x105   : > { %449 = vmatpush.msra.mxu0 %v1551_v29  ;;  %475 = vmatpush.msra.mxu1 %v474_v50  ;;  %v675_v57 = vsub.f32 %v410_v48, %v1596_v51 }
 0x106   : > { %527 = vmatpush.msra.mxu2 %v1562_v33  ;;  %557 = vmatpush.msra.mxu3 %v1551_v29  ;;  %v683_v6 = vsub.f32 %v1592_v42, %v682_v60  ;;  %v873_v32 = vsub.f32 %v411_v22, %v1641_v26 }
 0x107   : > { %579 = vmatpush.msrb.mxu0 %v472_v37  ;;  %v676_v61 = vand.u32 4294901760, %v675_v57  ;;  %481 = vmatpush.msra.mxu1 %v480_v58 }
 0x108   : > { %673 = vmatpush.msrb.mxu3 %v672_v52  ;;  %530 = vmatpush.msra.mxu2 %v1574_v40  ;;  %v684_v12 = vand.u32 4294901760, %v683_v6  ;;  %v874_v38 = vand.u32 4294901760, %v873_v32 }
 0x109   : > { %583 = vmatpush.msrb.mxu0 %v478_v35  ;;  %v677_v2 = vsub.f32 %v675_v57, %v676_v61  ;;  %v404_v3 = vld [vmem:[#allocation2 + $0x20] sm:$0xff]  ;;  %487 = vmatpush.msra.mxu1 %v486_v63  ;;  %v868_v35 = vand.u32 4294901760, %v867_v27 }
 0x10a   : > { %639 = vmatpush.msrb.mxu2 %v1553_v30  ;;  %v1617_v5 = vand.u32 4294901760, %v404_v3  ;;  %455 = vmatmul.f32.vlgmr.msra.gmra.mxu0 %v1613_v1 }
 0x10b   : > { %533 = vmatmul.f32.vlgmr.msra.gmra.mxu2 %v1556_v31  ;;  %587 = vmatpush.msrb.mxu0 %v484_v41  ;;  %v678_v7 = vand.u32 4294901760, %v677_v2  ;;  %v875_v41 = vsub.f32 %v873_v32, %v874_v38 }
 0x10c   : > { %641 = vmatpush.msrb.mxu2 %v1596_v51  ;;  %493 = vmatpush.msra.mxu1 %v492_v4  ;;  %v687_v10 = vsub.f32 %v404_v3, %v1617_v5 }
 0x10d   : > { %591 = vmatpush.msrb.mxu0 %v490_v49  ;;  %679 = vmatpush.msrb.mxu3 %v678_v7  ;;  %v876_v47 = vand.u32 4294901760, %v875_v41 }
 0x10e   : > { %643 = vmatpush.msrb.mxu2 %v1568_v36  ;;  %499 = vmatpush.msra.mxu1 %v498_v9  ;;  %v688_v13 = vand.u32 4294901760, %v687_v10 }
 0x10f   : > { %595 = vmatpush.msrb.mxu0 %v496_v54  ;;  %685 = vmatpush.msrb.mxu3 %v684_v12 }
 0x110   : > { %613 = vmatpush.msrb.mxu1 %v1544_v25  ;;  %645 = vmatpush.msrb.mxu2 %v1617_v5  ;;  %v689_v18 = vsub.f32 %v687_v10, %v688_v13  ;;  %v696_v25 = vand.u32 4294901760, %v695_v21 }
 0x111   : > { %561 = vmatmul.f32.vlgmr.msra.gmra.mxu3 %v1578_v43  ;;  %716 = vmatpush.msra.mxu0 %v1565_v34 }
 0x112   : > { %615 = vmatpush.msrb.mxu1 %v1528_v11  ;;  %647 = vmatpush.msrb.mxu2 %v1609_v62  ;;  %v690_v19 = vand.u32 4294901760, %v689_v18  ;;  %v408_v11 = vld [vmem:[#allocation2 + $0x40] sm:$0xff] }
 0x113   : > { %501 = vmatmul.f32.vlgmr.msra.gmra.mxu1 %v1532_v16  ;;  %719 = vmatpush.msra.mxu0 %v675_v57  ;;  %v1646_v28 = vand.u32 4294901760, %v408_v11 }
 0x114   : > { %777 = vmatpush.msra.mxu2 %v670_v39  ;;  %617 = vmatpush.msrb.mxu1 %v1530_v15  ;;  %v405_v15 = vld [vmem:[#allocation2 + $0x28] sm:$0xff] }
 0x115   : > { %722 = vmatpush.msra.mxu0 %v1592_v42  ;;  %691 = vmatpush.msrb.mxu3 %v690_v19  ;;  %v1651_v33 = vand.u32 4294901760, %v405_v15 }
 0x116   : > { %781 = vmatpush.msra.mxu2 %v676_v61  ;;  %619 = vmatpush.msrb.mxu1 %v1542_v23  ;;  %v402_v23 = vld [vmem:[#allocation2 + $0x10] sm:$0xff] }
 0x117   : > { %653 = vmatmul.f32.vlgmr.msrb.gmra.mxu2 %v1613_v1  ;;  %725 = vmatpush.msra.mxu0 %v687_v10  ;;  %v844_v34 = vand.u32 4294901760, %v402_v23  ;;  %v885_v37 = vsub.f32 %v405_v15, %v1651_v33 }
 0x118   : > { %785 = vmatpush.msra.mxu2 %v682_v60  ;;  %621 = vmatpush.msrb.mxu1 %v1551_v29  ;;  %v879_v29 = vsub.f32 %v408_v11, %v1646_v28 }
 0x119   : > { %697 = vmatpush.msrb.mxu3 %v696_v25  ;;  %597 = vmatmul.f32.vlgmr.msrb.gmra.mxu0 %v1532_v16  ;;  %v891_v39 = vsub.f32 %v402_v23, %v844_v34  ;;  %v886_v44 = vand.u32 4294901760, %v885_v37 }
 0x11a   : > { %699 = vmatmul.f32.vlgmr.msrb.gmra.mxu3 %v1532_v16  ;;  %728 = vmatpush.msra.mxu0 %v693_v8  ;;  %v880_v40 = vand.u32 4294901760, %v879_v29 }
 0x11b   : > { %747 = vmatpush.msra.mxu1 %v1553_v30  ;;  %789 = vmatpush.msra.mxu2 %v688_v13  ;;  %v892_v46 = vand.u32 4294901760, %v891_v39  ;;  %v887_v48 = vsub.f32 %v885_v37, %v886_v44 }
 0x11c   : > { %811 = vmatpush.msra.mxu3 %v1553_v30  ;;  %837 = vmatpush.msrb.mxu0 %v1637_v24  ;;  %v869_v30 = vsub.f32 %v867_v27, %v868_v35  ;;  %v881_v45 = vsub.f32 %v879_v29, %v880_v40 }
 0x11d   : > { %623 = vmatmul.f32.vlgmr.msrb.gmra.mxu1 %v1532_v16  ;;  %793 = vmatpush.msra.mxu2 %v694_v14  ;;  %v893_v42 = vsub.f32 %v891_v39, %v892_v46  ;;  %v888_v50 = vand.u32 4294901760, %v887_v48 }
 0x11e   : > { %749 = vmatpush.msra.mxu1 %v1596_v51  ;;  %813 = vmatpush.msra.mxu3 %v1596_v51  ;;  %v882_v49 = vand.u32 4294901760, %v881_v45 }
 0x11f   : > { %839 = vmatpush.msrb.mxu0 %v1641_v26  ;;  %914 = vmatpush.msrb.mxu2 %v867_v27  ;;  %v894_v51 = vand.u32 4294901760, %v893_v42 }
 0x120   : > { %751 = vmatpush.msra.mxu1 %v1568_v36  ;;  %815 = vmatpush.msra.mxu3 %v1568_v36  ;;  %v870_v36 = vand.u32 4294901760, %v869_v30 }
 0x121   : > { %841 = vmatpush.msrb.mxu0 %v1646_v28  ;;  %917 = vmatpush.msrb.mxu2 %v873_v32 }
 0x122   : > { %753 = vmatpush.msra.mxu1 %v1617_v5  ;;  %795 = vmatmul.f32.vlgmr.msra.gmra.mxu2 %v1532_v16 }
 0x123   : > { %817 = vmatpush.msra.mxu3 %v1617_v5  ;;  %843 = vmatpush.msrb.mxu0 %v1651_v33 }
 0x124   : > { %920 = vmatpush.msrb.mxu2 %v879_v29  ;;  %731 = vmatmul.f32.vlgmr.msra.gmra.mxu0 %v1556_v31 }
 0x125   : > { %755 = vmatpush.msra.mxu1 %v1609_v62  ;;  %819 = vmatpush.msra.mxu3 %v1609_v62 }
 0x126   : > { %821 = vmatmul.f32.vlgmr.msra.gmra.mxu3 %v1532_v16  ;;  %845 = vmatpush.msrb.mxu0 %v844_v34 }
 0x127   : > { %871 = vmatpush.msrb.mxu1 %v870_v36  ;;  %923 = vmatpush.msrb.mxu2 %v885_v37 }
 0x128   : > { %945 = vmatpush.msrb.mxu3 %v1637_v24  ;;  %759 = vmatmul.f32.vlgmr.msra.gmra.mxu1 %v1578_v43 }
 0x129   : > { %975 = vmatpush.msra.mxu0 %v868_v35  ;;  %877 = vmatpush.msrb.mxu1 %v876_v47 }
 0x12a   : > { %926 = vmatpush.msrb.mxu2 %v891_v39  ;;  %947 = vmatpush.msrb.mxu3 %v1641_v26 }
 0x12b   : > { %979 = vmatpush.msra.mxu0 %v874_v38  ;;  %883 = vmatpush.msrb.mxu1 %v882_v49 }
 0x12c   : > { %949 = vmatpush.msrb.mxu3 %v1646_v28  ;;  %929 = vmatmul.f32.vlgmr.msrb.gmra.mxu2 %v1556_v31 }
 0x12d   : > { %983 = vmatpush.msra.mxu0 %v880_v40  ;;  %889 = vmatpush.msrb.mxu1 %v888_v50 }
 0x12e   : > { %951 = vmatpush.msrb.mxu3 %v1651_v33  ;;  %851 = vmatmul.f32.vlgmr.msrb.gmra.mxu0 %v1613_v1 }
 0x12f   : > { %987 = vmatpush.msra.mxu0 %v886_v44  ;;  %895 = vmatpush.msrb.mxu1 %v894_v51 }
 0x130   : > { %953 = vmatpush.msrb.mxu3 %v844_v34  ;;  %897 = vmatmul.f32.vlgmr.msrb.gmra.mxu1 %v1532_v16 }
 0x131   : > { %957 = vmatmul.f32.vlgmr.msrb.gmra.mxu3 %v1578_v43  ;;  %991 = vmatpush.msra.mxu0 %v892_v46 }
 0x132   : > { %1009 = vmatpush.msra.mxu1 %v1637_v24 }
 0x134   : > { %1011 = vmatpush.msra.mxu1 %v1641_v26 }
 0x136   : > { %1013 = vmatpush.msra.mxu1 %v1646_v28  ;;  %993 = vmatmul.f32.vlgmr.msra.gmra.mxu0 %v1532_v16 }
 0x138   : > { %1015 = vmatpush.msra.mxu1 %v1651_v33 }
 0x13a   : > { %1017 = vmatpush.msra.mxu1 %v844_v34 }
 0x13b   : > { %1019 = vmatmul.f32.vlgmr.msra.gmra.mxu1 %v1532_v16 }
 0x187   : > { %v456_v31 = vpop.f32.mrf.mxu0 }
 0x18e   : > { %v534_v53 = vpop.f32.mrf.mxu2 }
 0x190   : > { %v502_v52 = vpop.f32.mrf.mxu1 }
 0x191   : > { %v503_v54 = vadd.f32 %v502_v52, %v456_v31 }
 0x193   : > { %v535_v43 = vadd.f32 %v534_v53, %v503_v54 }
 0x194   : > { %v562_v55 = vpop.f32.mrf.mxu3 }
 0x195   : > { %v563_v56 = vadd.f32 %v562_v55, %v535_v43 }
 0x196   : > { %v598_v57 = vpop.f32.mrf.mxu0 }
 0x197   : > { %v599_v58 = vadd.f32 %v598_v57, %v563_v56 }
 0x19a   : > { %v624_v59 = vpop.f32.mrf.mxu1  ;;  %v654_v61 = vpop.f32.mrf.mxu2 }
 0x19b   : > { %v625_v60 = vadd.f32 %v624_v59, %v599_v58 }
 0x19d   : > { %1023 = vst [vmem:[%s1688_s19] sm:$0xff] %v625_v60  ;;  %v700_v16 = vpop.f32.mrf.mxu3 }
 0x19e   : > { %v701_v62 = vadd.f32 %v700_v16, %v654_v61 }
 0x1a1   : > { %v732_v63 = vpop.f32.mrf.mxu0 }
 0x1a2   : > { %v733_v0 = vadd.f32 %v732_v63, %v701_v62 }
 0x1a5   : > { %v760_v1 = vpop.f32.mrf.mxu1  ;;  %v796_v2 = vpop.f32.mrf.mxu2 }
 0x1a6   : > { %v761_v3 = vadd.f32 %v760_v1, %v733_v0 }
 0x1a8   : > { %v797_v4 = vadd.f32 %v796_v2, %v761_v3 }
 0x1a9   : > { %v822_v5 = vpop.f32.mrf.mxu3 }
 0x1aa   : > { %v823_v6 = vadd.f32 %v822_v5, %v797_v4 }
 0x1ab   : > { %v852_v7 = vpop.f32.mrf.mxu0 }
 0x1ac   : > { %1024 = vst [vmem:[%s1688_s19 + $0x8] sm:$0xff] %v823_v6 }
 0x1ad   : > { %v898_v8 = vpop.f32.mrf.mxu1 }
 0x1ae   : > { %v899_v9 = vadd.f32 %v898_v8, %v852_v7 }
 0x1af   : > { %v930_v10 = vpop.f32.mrf.mxu2 }
 0x1b0   : > { %v931_v12 = vadd.f32 %v930_v10, %v899_v9 }
 0x1b3   : > { %v994_v14 = vpop.f32.mrf.mxu0 }
 0x1b4   : > { %v958_v13 = vpop.f32.mrf.mxu3 }
 0x1b5   : > { %v959_v17 = vadd.f32 %v958_v13, %v931_v12 }
 0x1b7   : > { %v995_v18 = vadd.f32 %v994_v14, %v959_v17 }
 0x1b8   : > { %v1020_v19 = vpop.f32.mrf.mxu1 }
 0x1b9   : > { %v1021_v20 = vadd.f32 %v1020_v19, %v995_v18 }
 0x1bb   : > { %1026 = vst.msk [vmem:[%s1688_s19 + $0x10] sm:$0xff] %vm1025_vm12, %v1021_v20 }
 0x1bc   : > { %1291 = shalt.err (!%p1288_p11)
}
 0x1bd   : > { %1145 = dma.vmem_to_hbm [thread:$0]  (%p1427_p7), %s1042_s29, 384, %s1044_s30, %s1028_s13  }
 0x1be PF: > { %s1055_s28 = sand.u32 1, %s1322_s9   ;;  %p1735_p12 = scmp.ge.s32.totalorder %s1334_s12, 2 }
 0x1bf   : > { %s1056_s8 = scalar_lea.sflag [#allocation5], %s1055_s28 }
 0x1c0   : > { %p1156_p13 = pnand %p1735_p12, %p1395_p6 }
 0x1c2   : > { %p1157_p0 = pneg %p1156_p13 }
 0x1c4   : > { %1317 = dma.done.wait (%p1157_p0), %s1056_s8, 384  }
 0x1c5   : > { %1319 = vsyncadd (%p1157_p0), %s1056_s8, 4294966912  ;;  %p16_p3 = scmp.ge.s32.totalorder %s1413_s23, 4   ;;  %s1736_s9 = smov %s1326_s10 }
 0x1c6   : > { %s1737_s10 = smov %s1330_s11  ;;  %s1738_s11 = smov %s1423_s26 }
 0x1c7   : > { %s1739_s12 = smov %s1413_s23  ;;  %18 = sbr.rel (!%p16_p3) target bundleno = 6 (0x6), region = 90 }
 0x1cc   :  { %1062 = vsyncpa [#allocation4], 1 }
 0x1cd   :  { %1064 = vsyncpa [#allocation4 + $0x1], 1 }
 0x1ce   :  { %1065 = vsyncpa [#allocation7], 1 }
 0x1cf   :  { %1066 = vsyncpa [#allocation5], 1 }
 0x1d0   :  { %1068 = vsyncpa [#allocation5 + $0x1], 1 }

</bundles_post_ra>
